<compile_context>
chip_gen: v5e
topology: v5e:2x2
jax: 0.10.0
libtpu: 0.0.40
codegen_flags: <defaults>
</compile_context>

<pallas_src>
import functools

import jax
import jax.numpy as jnp
from jax.experimental import pallas as pl
from jax.experimental.pallas import tpu as pltpu


def _round_up(n: int, m: int) -> int:
    return ((n + m - 1) // m) * m


def _cdiv(a: int, b: int) -> int:
    return (a + b - 1) // b


def _make_kernel(F: int, tile_f: int):
    needs_f_mask = (F % tile_f) != 0

    def kernel(x_ref, w_ref, b_ref, o_ref):
        # x_ref: (tile_b, tile_f) VMEM (streamed)   w_ref: (1, tile_f) VMEM
        # b_ref: (1, 1) SMEM scalar                  o_ref: (tile_b, 1) VMEM (resident over F axis)
        fk = pl.program_id(1)

        @pl.when(fk == 0)
        def _():
            o_ref[...] = jnp.zeros_like(o_ref)

        prod = x_ref[...] * w_ref[...]                       # (tile_b, tile_f), VPU
        if needs_f_mask:
            # zero the stale columns of the last partial F block
            col = fk * tile_f + jax.lax.broadcasted_iota(jnp.int32, prod.shape, 1)
            prod = jnp.where(col < F, prod, 0.0)
        o_ref[...] += jnp.sum(prod, axis=-1, keepdims=True)  # lane reduce (XLU)

        @pl.when(fk == pl.num_programs(1) - 1)
        def _():
            z = o_ref[...] + b_ref[0, 0]
            # exact sigmoid: exp on the EUP, exact reciprocal (keeps the 1e-5 check tight)
            o_ref[...] = pl.reciprocal(1.0 + jnp.exp(-z), approx=False)

    return kernel


def binary_lr_forward(x, weight, bias, *, tile_b=None, tile_f=None,
                      target_block_bytes=2 << 20,
                      vmem_input_budget_bytes=32 << 20):
    """sigmoid(x @ weight^T + bias).

    x: (B, F) f32, weight: (1, F) f32 (nn.Linear weight), bias: (1,) f32.
    Returns (B, 1) f32.
    """
    B, F = x.shape
    x = jnp.asarray(x, jnp.float32)
    w_row = jnp.asarray(weight, jnp.float32).reshape(1, F)
    b_sc = jnp.asarray(bias, jnp.float32).reshape(1, 1)

    itemsize = 4
    max_block_bytes = vmem_input_budget_bytes // 2   # x blocks are double-buffered

    # ---- batch tile: target ~2 MiB streamed blocks, multiple of 8 (sublane dim) ----
    if tile_b is None:
        tile_b = max(512, target_block_bytes // (itemsize * F))
    tile_b = _round_up(max(int(tile_b), 8), 8)
    tile_b = min(tile_b, _round_up(B, 8))
    # v7x megacore: give both TensorCores work when the batch is large enough
    if tile_b >= B and B >= 4096:
        tile_b = _round_up(_cdiv(B, 2), 8)

    # ---- feature tile: only tile F when the un-tiled block would blow the budget ----
    if tile_f is None:
        if itemsize * tile_b * F <= max_block_bytes:
            tile_f = F
        else:
            tile_f = (max_block_bytes // (itemsize * tile_b)) // 128 * 128
            while tile_f < 128 and tile_b > 8:
                tile_b = max(8, _round_up(tile_b // 2, 8))
                tile_f = (max_block_bytes // (itemsize * tile_b)) // 128 * 128
            tile_f = max(128, min(tile_f, _round_up(F, 128)))
    else:
        tile_f = int(tile_f)
        tile_f = F if tile_f >= F else _round_up(max(tile_f, 128), 128)

    grid = (_cdiv(B, tile_b), _cdiv(F, tile_f))

    # VMEM footprint: 2x streamed x block + 2x weight row block + resident output column
    vmem_bytes = 2 * itemsize * tile_b * tile_f + 2 * itemsize * tile_f + itemsize * tile_b
    vmem_limit = min(56 << 20, max(32 << 20, int(vmem_bytes * 1.5) + (1 << 20)))

    kernel = _make_kernel(F, tile_f)

    out = pl.pallas_call(
        kernel,
        out_shape=jax.ShapeDtypeStruct((B, 1), jnp.float32),
        grid=grid,
        in_specs=[
            pl.BlockSpec((tile_b, tile_f), lambda i, k: (i, k)),    # streamed x blocks
            pl.BlockSpec((1, tile_f), lambda i, k: (0, k)),         # weight row (resident per-k)
            pl.BlockSpec(memory_space=pltpu.MemorySpace.SMEM),      # scalar bias in SMEM
        ],
        out_specs=pl.BlockSpec((tile_b, 1), lambda i, k: (i, 0)),   # resident across the F axis
        compiler_params=pltpu.CompilerParams(
            dimension_semantics=("parallel", "arbitrary"),          # batch sharded / F reduction
            vmem_limit_bytes=vmem_limit,
        ),
    )(x, w_row, b_sc)

    return out


if __name__ == "__main__":
    key = jax.random.PRNGKey(0)
    kx, kw, kb = jax.random.split(key, 3)

    # Small shapes matching nn.Linear(n_input_features=32, 1) + sigmoid
    B, F = 8, 32
    x = jax.random.normal(kx, (B, F), dtype=jnp.float32)
    bound = float(1.0 / jnp.sqrt(jnp.float32(F)))
    w_torch = jax.random.uniform(kw, (1, F), jnp.float32, -bound, bound)
    b_torch = jax.random.uniform(kb, (1,), jnp.float32, -bound, bound)

    y = binary_lr_forward(x, w_torch, b_torch)
    y = jax.block_until_ready(y)
    y_ref = jax.nn.sigmoid(x @ w_torch.T + b_torch)
    assert y.shape == (B, 1)
    assert jnp.allclose(y, y_ref, atol=1e-5, rtol=1e-5)

    # Second check: non-aligned B/F with forced small tiles to exercise partial
    # batch blocks, the F reduction axis, and the F-tail lane mask.
    k2x, k2w, k2b = jax.random.split(jax.random.PRNGKey(1), 3)
    B2, F2 = 100, 300
    x2 = jax.random.normal(k2x, (B2, F2), dtype=jnp.float32)
    bound2 = float(1.0 / jnp.sqrt(jnp.float32(F2)))
    w2 = jax.random.uniform(k2w, (1, F2), jnp.float32, -bound2, bound2)
    b2 = jax.random.uniform(k2b, (1,), jnp.float32, -bound2, bound2)
    y2 = jax.block_until_ready(binary_lr_forward(x2, w2, b2, tile_b=48, tile_f=128))
    y2_ref = jax.nn.sigmoid(x2 @ w2.T + b2)
    assert y2.shape == (B2, 1)
    assert jnp.allclose(y2, y2_ref, atol=1e-5, rtol=1e-5)

    print("KERNEL_OK")
</pallas_src>

<mosaic_0001>
module attributes {stable_mosaic.version = 11 : i64} {
  func.func @kernel(%arg0: i32, %arg1: i32, %arg2: memref<8x32xf32, #tpu.memory_space<vmem>>, %arg3: memref<1x32xf32, #tpu.memory_space<vmem>>, %arg4: memref<1x1xf32, #tpu.memory_space<smem>>, %arg5: memref<8x1xf32, #tpu.memory_space<vmem>>) attributes {dimension_semantics = [#tpu.dimension_semantics<parallel>, #tpu.dimension_semantics<arbitrary>], iteration_bounds = array<i64: 1, 1>, scalar_prefetch = 0 : i64, scratch_operands = 0 : i64, tpu.core_type = #tpu.core_type<tc>, window_params = [{transform_indices = @transform_0, window_bounds = array<i64: 8, 32>}, {transform_indices = @transform_1, window_bounds = array<i64: 1, 32>}, {transform_indices = @transform_2, window_bounds = array<i64: 1, 1>}, {transform_indices = @transform_3, window_bounds = array<i64: 8, 1>}]} {
    %c0_i32 = arith.constant 0 : i32
    %0 = arith.cmpi eq, %arg1, %c0_i32 : i32
    %1 = arith.extui %0 : i1 to i32
    %c0_i32_0 = arith.constant 0 : i32
    %2 = arith.cmpi ne, %1, %c0_i32_0 : i32
    scf.if %2 {
      %cst_10 = arith.constant 0.000000e+00 : f32
      %15 = vector.broadcast %cst_10 : f32 to vector<8x1xf32>
      %c0_11 = arith.constant 0 : index
      %c0_12 = arith.constant 0 : index
      %16 = vector.load %arg5[%c0_11, %c0_12] : memref<8x1xf32, #tpu.memory_space<vmem>>, vector<8x1xf32>
      tpu.vector_store %arg5[%c0_11, %c0_12], %15 {strides = array<i32>} : memref<8x1xf32, #tpu.memory_space<vmem>>, vector<8x1xf32>,
    } else {
    }
    %c0 = arith.constant 0 : index
    %c0_1 = arith.constant 0 : index
    %3 = vector.load %arg2[%c0, %c0_1] : memref<8x32xf32, #tpu.memory_space<vmem>>, vector<8x32xf32>
    %c0_2 = arith.constant 0 : index
    %c0_3 = arith.constant 0 : index
    %4 = vector.load %arg3[%c0_2, %c0_3] : memref<1x32xf32, #tpu.memory_space<vmem>>, vector<1x32xf32>
    %5 = vector.broadcast %4 : vector<1x32xf32> to vector<8x32xf32>
    %6 = arith.mulf %3, %5 : vector<8x32xf32>
    %c0_4 = arith.constant 0 : index
    %c0_5 = arith.constant 0 : index
    %7 = vector.load %arg5[%c0_4, %c0_5] : memref<8x1xf32, #tpu.memory_space<vmem>>, vector<8x1xf32>
    %cst = arith.constant dense<0.000000e+00> : vector<8xf32>
    %8 = vector.multi_reduction <add>, %6, %cst [1] : vector<8x32xf32> to vector<8xf32>
    %9 = vector.shape_cast %8 : vector<8xf32> to vector<8x1xf32>
    %10 = arith.addf %7, %9 : vector<8x1xf32>
    %c0_6 = arith.constant 0 : index
    %c0_7 = arith.constant 0 : index
    %11 = vector.load %arg5[%c0_6, %c0_7] : memref<8x1xf32, #tpu.memory_space<vmem>>, vector<8x1xf32>
    tpu.vector_store %arg5[%c0_6, %c0_7], %10 {strides = array<i32>} : memref<8x1xf32, #tpu.memory_space<vmem>>, vector<8x1xf32>,
    %c0_i32_8 = arith.constant 0 : i32
    %12 = arith.cmpi eq, %arg1, %c0_i32_8 : i32
    %13 = arith.extui %12 : i1 to i32
    %c0_i32_9 = arith.constant 0 : i32
    %14 = arith.cmpi ne, %13, %c0_i32_9 : i32
    scf.if %14 {
      %c0_10 = arith.constant 0 : index
      %c0_11 = arith.constant 0 : index
      %15 = vector.load %arg5[%c0_10, %c0_11] : memref<8x1xf32, #tpu.memory_space<vmem>>, vector<8x1xf32>
      %c0_12 = arith.constant 0 : index
      %c0_13 = arith.constant 0 : index
      %16 = memref.load %arg4[%c0_12, %c0_13] : memref<1x1xf32, #tpu.memory_space<smem>>
      %17 = vector.broadcast %16 : f32 to vector<8x1xf32>
      %18 = arith.addf %15, %17 : vector<8x1xf32>
      %cst_14 = arith.constant 0.000000e+00 : f32
      %19 = vector.broadcast %cst_14 : f32 to vector<8x1xf32>
      %20 = arith.subf %19, %18 : vector<8x1xf32>
      %21 = math.exp %20 : vector<8x1xf32>
      %cst_15 = arith.constant 1.000000e+00 : f32
      %22 = vector.broadcast %cst_15 : f32 to vector<8x1xf32>
      %23 = arith.addf %22, %21 : vector<8x1xf32>
      %24 = tpu.reciprocal %23 : vector<8x1xf32> -> vector<8x1xf32>
      %c0_16 = arith.constant 0 : index
      %c0_17 = arith.constant 0 : index
      %25 = vector.load %arg5[%c0_16, %c0_17] : memref<8x1xf32, #tpu.memory_space<vmem>>, vector<8x1xf32>
      tpu.vector_store %arg5[%c0_16, %c0_17], %24 {strides = array<i32>} : memref<8x1xf32, #tpu.memory_space<vmem>>, vector<8x1xf32>,
    } else {
    }
    return
  }
  func.func @transform_0(%arg0: i32, %arg1: i32) -> (i32, i32) {
    %c0_i32 = arith.constant 0 : i32
    return %arg0, %arg1 : i32, i32
  }
  func.func @transform_1(%arg0: i32, %arg1: i32) -> (i32, i32) {
    %c0_i32 = arith.constant 0 : i32
    %c0_i32_0 = arith.constant 0 : i32
    return %c0_i32, %arg1 : i32, i32
  }
  func.func @transform_2(%arg0: i32, %arg1: i32) -> (i32, i32) {
    %c0_i32 = arith.constant 0 : i32
    %c0_i32_0 = arith.constant 0 : i32
    %c0_i32_1 = arith.constant 0 : i32
    return %c0_i32, %c0_i32_0 : i32, i32
  }
  func.func @transform_3(%arg0: i32, %arg1: i32) -> (i32, i32) {
    %c0_i32 = arith.constant 0 : i32
    %c0_i32_0 = arith.constant 0 : i32
    return %arg0, %c0_i32 : i32, i32
  }
}

</mosaic_0001>

<bundles_post_ra>
// kernel: tpu_custom_call.1
= control target key start
LH: loop header
LB: loop body
LE: loop exit
PB: predicated region body
PF: predicated region fallthrough
CT: control target
= control target key end

     0   :  { %9 = vsyncpa [#allocation4], 0  ;;  %s113_s15 = smov [#allocation3]   ;;  %s162_s0 = inlined_call_operand.hbm [shape: f32[8,32], index: 0, kind: input, shape index: {}]   ;;  %s163_s1 = inlined_call_operand.vmem [shape: f32[1,32], index: 1, kind: input, shape index: {}]   ;;  %s164_s2 = inlined_call_operand.<no memory space> [shape: f32[1,1], index: 2, kind: input, shape index: {}]   ;;  %s165_s3 = inlined_call_operand.vmem [shape: f32[8,1], index: 3, kind: output, shape index: {}]  }
   0x1   :  { %s15_s14 = sshll.u32 %s162_s0, 4  ;;  %s17_s16 = sshll.u32 %s113_s15, 4  ;;  %s16_s14 = int_to_ptr.hbm [resolvable:$true] %s15_s14  ;;  %s18_s16 = int_to_ptr.vmem [resolvable:$true] %s17_s16 }
   0x2   :  { %20 = dma.hbm_to_vmem [thread:$0]  %s16_s14, 128, %s18_s16, [#allocation4]  }
   0x3   :  { %111 = dma.done.wait [#allocation4], 128  }
   0x4   :  { %112 = vsyncadd [#allocation4], 4294967168  ;;  %vm33_vm0 = vcmask 7168   ;;  %v114_v0 = vmov 0.0   ;;  %v35_v1 = vld [vmem:[#allocation3] sm:$0xff]  ;;  %vm42_vm1 = vcmask 261120   ;;  %v54_v8 = vstv %s164_s2 }
   0x5   :  { %34 = vst.msk [vmem:[%s165_s3] sm:$0xff] %vm33_vm0, %v114_v0  ;;  %v82_v2 = vld [vmem:[%s163_s1] ss:$0 sm:$0xff] }
   0x6   :  { %v40_v3 = vmul.f32 %v82_v2, %v35_v1 }
   0x8   :  { %v43_v4 = vsel %vm42_vm1, %v40_v3, 0.0 }
   0x9   :  { %44 = vadd.xlane.f32.xlu0 %v43_v4 }
   0xc   :  { %v41_v5 = vld [vmem:[%s165_s3] sm:$0xff] }
  0x7c   :  { %v45_v6 = vpop.xlane.xlu0 %44 }
  0x7d   :  { %v46_v7 = vadd.f32 %v45_v6, %v41_v5 }
  0x7f   :  { %48 = vst.msk [vmem:[%s165_s3] sm:$0xff] %vm33_vm0, %v46_v7 }
  0x86   :  { %v52_v9 = vld [vmem:[%s165_s3] sm:$0xff] }
  0x87   :  { %v55_v10 = vadd.f32 %v54_v8, %v52_v9 }
  0x89   :  { %v56_v11 = vsub.f32 0.0, %v55_v10 }
  0x8b   :  { %v57_v12 = vmul.f32 1.442695, %v56_v11 }
  0x8d   :  { %83 = vpow2.f32 %v57_v12 }
  0x93   :  { %v84_v13 = vpop.eup %83 }
  0x94   :  { %v59_v14 = vadd.f32 1.0, %v84_v13 }
  0x96   :  { %85 = vrcp.f32 %v59_v14  ;;  %v71_v18 = vand.u32 2147483648, %v59_v14  ;;  %v69_v20 = vand.u32 2147483647, %v59_v14  ;;  %vm65_vm3 = vweird.f32 %v59_v14 }
  0x98   :  { %v72_v22 = vor.u32 1.1754944e-38, %v71_v18  ;;  %vm70_vm5 = vcmp.eq.f32.partialorder %v69_v20, 8.507059e+37 }
  0x9c   :  { %v86_v15 = vpop.eup %85 }
  0x9d   :  { %v61_v16 = vmul.f32 %v86_v15, %v59_v14  ;;  %vm66_vm2 = vweird.f32 %v86_v15 }
  0x9e   :  { %vm67_vm4 = vmor %vm65_vm3, %vm66_vm2 }
  0x9f   :  { %v62_v17 = vsub.f32 1.0, %v61_v16 }
  0xa1   :  { %v63_v19 = vmul.f32 %v86_v15, %v62_v17 }
  0xa3   :  { %v64_v21 = vadd.f32 %v86_v15, %v63_v19 }
  0xa5   :  { %v68_v23 = vsel %vm67_vm4, %v86_v15, %v64_v21 }
  0xa6   :  { %v73_v24 = vsel %vm70_vm5, %v72_v22, %v68_v23 }
  0xa7   :  { %74 = vst.msk [vmem:[%s165_s3] sm:$0xff] %vm33_vm0, %v73_v24 }
  0xa8   :  { %79 = vsyncpa [#allocation4], 1 }

</bundles_post_ra>
